<compile_context>
chip_gen: v6e
topology: v6e:2x2x1
jax: 0.10.0
libtpu: 0.0.40
codegen_flags: <defaults>
</compile_context>

<pallas_src>
import math

import jax
import jax.numpy as jnp
import numpy as np
from jax.experimental import pallas as pl
from jax.experimental.pallas import tpu as pltpu

LANE = 128
SUBLANE = 8
MAX_BLOCK_ROWS = 2048      # 2048 * 128 * 4B = 1 MiB per f32 input buffer


def _round_up(x, m):
    return ((x + m - 1) // m) * m


def _make_rd_kernel(lmbda, num_pixels, total_elems):
    inv_neg_log2_npix = 1.0 / (-math.log(2.0) * float(num_pixels))
    inv_total = 1.0 / float(total_elems)
    scale = float(lmbda) * (255.0 ** 2)

    def rd_loss_kernel(xhat_ref, tgt_ref, lik_ref,
                       bpp_ref, mse_ref, loss_ref,
                       sse_acc, log_acc):
        step = pl.program_id(0)
        nsteps = pl.num_programs(0)

        @pl.when(step == 0)
        def _init():
            sse_acc[...] = jnp.zeros_like(sse_acc)
            log_acc[...] = jnp.zeros_like(log_acc)

        # Squared-error partial sums: pure VPU adds into an (8,128) VMEM
        # accumulator, no per-step cross-lane reduction.
        d = xhat_ref[...].astype(jnp.float32) - tgt_ref[...].astype(jnp.float32)
        sse_acc[...] += jnp.sum((d * d).reshape(-1, SUBLANE, LANE), axis=0)

        # Log-likelihood partial sums (padding is 1.0 -> log == 0), f32 log.
        logs = jnp.log(lik_ref[...].astype(jnp.float32))
        log_acc[...] += jnp.sum(logs.reshape(-1, SUBLANE, LANE), axis=0)

        @pl.when(step == nsteps - 1)
        def _finalize():
            mse = jnp.sum(sse_acc[...]) * inv_total
            bpp = jnp.sum(log_acc[...]) * inv_neg_log2_npix
            mse_ref[0, 0] = mse
            bpp_ref[0, 0] = bpp
            loss_ref[0, 0] = scale * mse + bpp

    return rd_loss_kernel


def rate_distortion_loss(x_hat, target, likelihoods, lmbda=0.01):
    """JAX/Pallas equivalent of RateDistortionLoss(type='mse').forward.

    x_hat, target: (N, C, H, W) arrays (any float dtype).
    likelihoods:   dict of strictly-positive arrays (any shapes / count).
    Returns dict with 'bpp_loss', 'mse_loss', 'loss' (f32 scalars).
    """
    N, C, H, W = target.shape
    num_pixels = N * H * W
    total_elems = N * C * H * W

    # ---- lane-dense packing of the streamed image tensors ------------------
    rows = pl.cdiv(total_elems, LANE)
    block_rows = min(MAX_BLOCK_ROWS, _round_up(rows, SUBLANE))
    rows_p = _round_up(rows, block_rows)
    nblocks = rows_p // block_rows
    padded_len = rows_p * LANE

    def pack_image(a):
        flat = a.reshape(-1)
        # identical zero padding for both tensors -> diff == 0 on the pad.
        flat = jnp.pad(flat, (0, padded_len - total_elems))
        return flat.reshape(rows_p, LANE)

    xh2 = pack_image(x_hat)
    tg2 = pack_image(target)

    # ---- lane-dense packing of all likelihood tensors -----------------------
    lik_flat = jnp.concatenate([v.reshape(-1) for v in likelihoods.values()])
    lik_total = lik_flat.shape[0]
    lik_rows = pl.cdiv(lik_total, LANE)
    lik_block_rows = _round_up(pl.cdiv(lik_rows, nblocks), SUBLANE)
    lik_rows_p = lik_block_rows * nblocks
    # pad with 1.0 so log(pad) == 0 contributes nothing to the bpp sum.
    lik_flat = jnp.pad(lik_flat, (0, lik_rows_p * LANE - lik_total),
                       constant_values=1.0)
    lik2 = lik_flat.reshape(lik_rows_p, LANE)

    kernel = _make_rd_kernel(lmbda, num_pixels, total_elems)

    scalar_spec = pl.BlockSpec((1, 1), lambda i: (0, 0), memory_space=pltpu.SMEM)
    scalar_shape = jax.ShapeDtypeStruct((1, 1), jnp.float32)

    bytes_accessed = (xh2.size * xh2.dtype.itemsize
                      + tg2.size * tg2.dtype.itemsize
                      + lik2.size * lik2.dtype.itemsize + 3 * 4)
    cost = pl.CostEstimate(
        flops=3 * padded_len + 2 * lik_rows_p * LANE,
        transcendentals=lik_rows_p * LANE,
        bytes_accessed=bytes_accessed,
    )

    bpp, mse, loss = pl.pallas_call(
        kernel,
        out_shape=(scalar_shape, scalar_shape, scalar_shape),
        grid_spec=pltpu.PrefetchScalarGridSpec(
            num_scalar_prefetch=0,
            grid=(nblocks,),
            in_specs=[
                pl.BlockSpec((block_rows, LANE), lambda i: (i, 0)),
                pl.BlockSpec((block_rows, LANE), lambda i: (i, 0)),
                pl.BlockSpec((lik_block_rows, LANE), lambda i: (i, 0)),
            ],
            out_specs=(scalar_spec, scalar_spec, scalar_spec),
            scratch_shapes=[
                pltpu.VMEM((SUBLANE, LANE), jnp.float32),  # SSE partial sums
                pltpu.VMEM((SUBLANE, LANE), jnp.float32),  # log-lik partial sums
            ],
        ),
        compiler_params=pltpu.CompilerParams(
            dimension_semantics=("arbitrary",),
        ),
        cost_estimate=cost,
    )(xh2, tg2, lik2)

    return {
        "bpp_loss": bpp[0, 0],
        "mse_loss": mse[0, 0],
        "loss": loss[0, 0],
    }


def _reference(x_hat, target, likelihoods, lmbda=0.01):
    N, C, H, W = target.shape
    num_pixels = N * H * W
    bpp = sum(jnp.sum(jnp.log(v)) / (-math.log(2.0) * num_pixels)
              for v in likelihoods.values())
    mse = jnp.mean((x_hat - target) ** 2)
    loss = lmbda * 255.0 ** 2 * mse + bpp
    return {"bpp_loss": bpp, "mse_loss": mse, "loss": loss}


if __name__ == "__main__":
    key = jax.random.PRNGKey(0)
    k1, k2, k3, k4 = jax.random.split(key, 4)

    N, C, H, W = 2, 3, 16, 16
    target = jax.random.uniform(k1, (N, C, H, W), dtype=jnp.float32)
    x_hat = target + 0.05 * jax.random.normal(k2, (N, C, H, W), dtype=jnp.float32)

    # Synthetic likelihoods (strictly positive, in (0, 1]) as produced by an
    # entropy model's 'y' and 'z' branches.
    likelihoods = {
        "y": jax.random.uniform(k3, (N, 8, 4, 4), dtype=jnp.float32,
                                minval=0.05, maxval=1.0),
        "z": jax.random.uniform(k4, (N, 4, 2, 2), dtype=jnp.float32,
                                minval=0.05, maxval=1.0),
    }

    out = rate_distortion_loss(x_hat, target, likelihoods, lmbda=0.01)
    jax.block_until_ready(out["loss"])

    ref = _reference(x_hat, target, likelihoods, lmbda=0.01)
    for k in ("bpp_loss", "mse_loss", "loss"):
        np.testing.assert_allclose(np.asarray(out[k]), np.asarray(ref[k]),
                                   rtol=1e-4, atol=1e-6)

    # TODO(synk): type='ms_ssim' branch (compute_msssim) is not implemented.
    print("KERNEL_OK")
</pallas_src>

<mosaic_0001>
module attributes {stable_mosaic.version = 11 : i64} {
  func.func @rd_loss_kernel(%arg0: i32, %arg1: memref<16x128xf32, #tpu.memory_space<vmem>>, %arg2: memref<16x128xf32, #tpu.memory_space<vmem>>, %arg3: memref<8x128xf32, #tpu.memory_space<vmem>>, %arg4: memref<1x1xf32, #tpu.memory_space<smem>>, %arg5: memref<1x1xf32, #tpu.memory_space<smem>>, %arg6: memref<1x1xf32, #tpu.memory_space<smem>>, %arg7: memref<8x128xf32, #tpu.memory_space<vmem>>, %arg8: memref<8x128xf32, #tpu.memory_space<vmem>>) attributes {dimension_semantics = [#tpu.dimension_semantics<arbitrary>], iteration_bounds = array<i64: 1>, scalar_prefetch = 0 : i64, scratch_operands = 2 : i64, tpu.core_type = #tpu.core_type<tc>, window_params = [{transform_indices = @transform_0, window_bounds = array<i64: 16, 128>}, {transform_indices = @transform_1, window_bounds = array<i64: 16, 128>}, {transform_indices = @transform_2, window_bounds = array<i64: 8, 128>}, {transform_indices = @transform_3, window_bounds = array<i64: 1, 1>}, {transform_indices = @transform_4, window_bounds = array<i64: 1, 1>}, {transform_indices = @transform_5, window_bounds = array<i64: 1, 1>}]} {
    %c0_i32 = arith.constant 0 : i32
    %0 = arith.cmpi eq, %arg0, %c0_i32 : i32
    %1 = arith.extui %0 : i1 to i32
    %c0_i32_0 = arith.constant 0 : i32
    %2 = arith.cmpi ne, %1, %c0_i32_0 : i32
    scf.if %2 {
      %cst_17 = arith.constant 0.000000e+00 : f32
      %22 = vector.broadcast %cst_17 : f32 to vector<8x128xf32>
      %c0_18 = arith.constant 0 : index
      %c0_19 = arith.constant 0 : index
      %23 = vector.load %arg7[%c0_18, %c0_19] : memref<8x128xf32, #tpu.memory_space<vmem>>, vector<8x128xf32>
      tpu.vector_store %arg7[%c0_18, %c0_19], %22 {strides = array<i32>} : memref<8x128xf32, #tpu.memory_space<vmem>>, vector<8x128xf32>,
      %cst_20 = arith.constant 0.000000e+00 : f32
      %24 = vector.broadcast %cst_20 : f32 to vector<8x128xf32>
      %c0_21 = arith.constant 0 : index
      %c0_22 = arith.constant 0 : index
      %25 = vector.load %arg8[%c0_21, %c0_22] : memref<8x128xf32, #tpu.memory_space<vmem>>, vector<8x128xf32>
      tpu.vector_store %arg8[%c0_21, %c0_22], %24 {strides = array<i32>} : memref<8x128xf32, #tpu.memory_space<vmem>>, vector<8x128xf32>,
    } else {
    }
    %c0 = arith.constant 0 : index
    %c0_1 = arith.constant 0 : index
    %3 = vector.load %arg1[%c0, %c0_1] : memref<16x128xf32, #tpu.memory_space<vmem>>, vector<16x128xf32>
    %c0_2 = arith.constant 0 : index
    %c0_3 = arith.constant 0 : index
    %4 = vector.load %arg2[%c0_2, %c0_3] : memref<16x128xf32, #tpu.memory_space<vmem>>, vector<16x128xf32>
    %5 = arith.subf %3, %4 : vector<16x128xf32>
    %c0_4 = arith.constant 0 : index
    %c0_5 = arith.constant 0 : index
    %6 = vector.load %arg7[%c0_4, %c0_5] : memref<8x128xf32, #tpu.memory_space<vmem>>, vector<8x128xf32>
    %7 = arith.mulf %5, %5 : vector<16x128xf32>
    %8 = vector.shape_cast %7 : vector<16x128xf32> to vector<2x8x128xf32>
    %cst = arith.constant dense<0.000000e+00> : vector<8x128xf32>
    %9 = vector.multi_reduction <add>, %8, %cst [0] : vector<2x8x128xf32> to vector<8x128xf32>
    %10 = arith.addf %6, %9 : vector<8x128xf32>
    %c0_6 = arith.constant 0 : index
    %c0_7 = arith.constant 0 : index
    %11 = vector.load %arg7[%c0_6, %c0_7] : memref<8x128xf32, #tpu.memory_space<vmem>>, vector<8x128xf32>
    tpu.vector_store %arg7[%c0_6, %c0_7], %10 {strides = array<i32>} : memref<8x128xf32, #tpu.memory_space<vmem>>, vector<8x128xf32>,
    %c0_8 = arith.constant 0 : index
    %c0_9 = arith.constant 0 : index
    %12 = vector.load %arg3[%c0_8, %c0_9] : memref<8x128xf32, #tpu.memory_space<vmem>>, vector<8x128xf32>
    %13 = math.log %12 : vector<8x128xf32>
    %c0_10 = arith.constant 0 : index
    %c0_11 = arith.constant 0 : index
    %14 = vector.load %arg8[%c0_10, %c0_11] : memref<8x128xf32, #tpu.memory_space<vmem>>, vector<8x128xf32>
    %15 = vector.shape_cast %13 : vector<8x128xf32> to vector<1x8x128xf32>
    %cst_12 = arith.constant dense<0.000000e+00> : vector<8x128xf32>
    %16 = vector.multi_reduction <add>, %15, %cst_12 [0] : vector<1x8x128xf32> to vector<8x128xf32>
    %17 = arith.addf %14, %16 : vector<8x128xf32>
    %c0_13 = arith.constant 0 : index
    %c0_14 = arith.constant 0 : index
    %18 = vector.load %arg8[%c0_13, %c0_14] : memref<8x128xf32, #tpu.memory_space<vmem>>, vector<8x128xf32>
    tpu.vector_store %arg8[%c0_13, %c0_14], %17 {strides = array<i32>} : memref<8x128xf32, #tpu.memory_space<vmem>>, vector<8x128xf32>,
    %c0_i32_15 = arith.constant 0 : i32
    %19 = arith.cmpi eq, %arg0, %c0_i32_15 : i32
    %20 = arith.extui %19 : i1 to i32
    %c0_i32_16 = arith.constant 0 : i32
    %21 = arith.cmpi ne, %20, %c0_i32_16 : i32
    scf.if %21 {
      %c0_17 = arith.constant 0 : index
      %c0_18 = arith.constant 0 : index
      %22 = vector.load %arg7[%c0_17, %c0_18] : memref<8x128xf32, #tpu.memory_space<vmem>>, vector<8x128xf32>
      %23 = vector.shape_cast %22 : vector<8x128xf32> to vector<1x8x128xf32>
      %cst_19 = arith.constant dense<0.000000e+00> : vector<1xf32>
      %24 = vector.multi_reduction <add>, %23, %cst_19 [1, 2] : vector<1x8x128xf32> to vector<1xf32>
      %25 = vector.shape_cast %24 : vector<1xf32> to vector<1x1x1xf32>
      %26 = vector.extract %25[0, 0, 0] : f32 from vector<1x1x1xf32>
      %cst_20 = arith.constant 6.51041686E-4 : f32
      %27 = arith.mulf %26, %cst_20 : f32
      %c0_21 = arith.constant 0 : index
      %c0_22 = arith.constant 0 : index
      %28 = vector.load %arg8[%c0_21, %c0_22] : memref<8x128xf32, #tpu.memory_space<vmem>>, vector<8x128xf32>
      %29 = vector.shape_cast %28 : vector<8x128xf32> to vector<1x8x128xf32>
      %cst_23 = arith.constant dense<0.000000e+00> : vector<1xf32>
      %30 = vector.multi_reduction <add>, %29, %cst_23 [1, 2] : vector<1x8x128xf32> to vector<1xf32>
      %31 = vector.shape_cast %30 : vector<1xf32> to vector<1x1x1xf32>
      %32 = vector.extract %31[0, 0, 0] : f32 from vector<1x1x1xf32>
      %cst_24 = arith.constant -0.00281776371 : f32
      %33 = arith.mulf %32, %cst_24 : f32
      %c0_25 = arith.constant 0 : index
      %c0_26 = arith.constant 0 : index
      %34 = memref.load %arg5[%c0_25, %c0_26] : memref<1x1xf32, #tpu.memory_space<smem>>
      memref.store %27, %arg5[%c0_25, %c0_26] : memref<1x1xf32, #tpu.memory_space<smem>>
      %c0_27 = arith.constant 0 : index
      %c0_28 = arith.constant 0 : index
      %35 = memref.load %arg4[%c0_27, %c0_28] : memref<1x1xf32, #tpu.memory_space<smem>>
      memref.store %33, %arg4[%c0_27, %c0_28] : memref<1x1xf32, #tpu.memory_space<smem>>
      %cst_29 = arith.constant 6.502500e+02 : f32
      %36 = arith.mulf %cst_29, %27 : f32
      %37 = arith.addf %36, %33 : f32
      %c0_30 = arith.constant 0 : index
      %c0_31 = arith.constant 0 : index
      %38 = memref.load %arg6[%c0_30, %c0_31] : memref<1x1xf32, #tpu.memory_space<smem>>
      memref.store %37, %arg6[%c0_30, %c0_31] : memref<1x1xf32, #tpu.memory_space<smem>>
    } else {
    }
    return
  }
  func.func @transform_0(%arg0: i32) -> (i32, i32) {
    %c0_i32 = arith.constant 0 : i32
    %c0_i32_0 = arith.constant 0 : i32
    return %arg0, %c0_i32 : i32, i32
  }
  func.func @transform_1(%arg0: i32) -> (i32, i32) {
    %c0_i32 = arith.constant 0 : i32
    %c0_i32_0 = arith.constant 0 : i32
    return %arg0, %c0_i32 : i32, i32
  }
  func.func @transform_2(%arg0: i32) -> (i32, i32) {
    %c0_i32 = arith.constant 0 : i32
    %c0_i32_0 = arith.constant 0 : i32
    return %arg0, %c0_i32 : i32, i32
  }
  func.func @transform_3(%arg0: i32) -> (i32, i32) {
    %c0_i32 = arith.constant 0 : i32
    %c0_i32_0 = arith.constant 0 : i32
    %c0_i32_1 = arith.constant 0 : i32
    return %c0_i32, %c0_i32_0 : i32, i32
  }
  func.func @transform_4(%arg0: i32) -> (i32, i32) {
    %c0_i32 = arith.constant 0 : i32
    %c0_i32_0 = arith.constant 0 : i32
    %c0_i32_1 = arith.constant 0 : i32
    return %c0_i32, %c0_i32_0 : i32, i32
  }
  func.func @transform_5(%arg0: i32) -> (i32, i32) {
    %c0_i32 = arith.constant 0 : i32
    %c0_i32_0 = arith.constant 0 : i32
    %c0_i32_1 = arith.constant 0 : i32
    return %c0_i32, %c0_i32_0 : i32, i32
  }
}

</mosaic_0001>

<bundles_post_ra>
// kernel: tpu_custom_call.1
= control target key start
LH: loop header
LB: loop body
LE: loop exit
PB: predicated region body
PF: predicated region fallthrough
CT: control target
= control target key end

     0   :  { %11 = vsyncpa [#allocation5], 0  ;;  %s316_s0 = inlined_call_operand.hbm [shape: f32[16,128], index: 0, kind: input, shape index: {}]   ;;  %s317_s1 = inlined_call_operand.hbm [shape: f32[16,128], index: 1, kind: input, shape index: {}]   ;;  %s318_s2 = inlined_call_operand.hbm [shape: f32[8,128], index: 2, kind: input, shape index: {}]   ;;  %s319_s3 = inlined_call_operand.hbm [shape: f32[1,1], index: 3, kind: output, shape index: {0}]   ;;  %s320_s4 = inlined_call_operand.hbm [shape: f32[1,1], index: 4, kind: output, shape index: {1}]   ;;  %s321_s5 = inlined_call_operand.hbm [shape: f32[1,1], index: 5, kind: output, shape index: {2}]  }
   0x1   :  { %12 = vsyncpa [#allocation8], 0 }
   0x2   :  { %13 = vsyncpa [#allocation6], 0 }
   0x3   :  { %14 = vsyncpa [#allocation12], 0  ;;  %s260_s18 = smov [#allocation7]   ;;  %s261_s20 = smov [#allocation4]  }
   0x4   :  { %s32_s19 = sshll.u32 %s260_s18, 4  ;;  %s20_s21 = sshll.u32 %s261_s20, 4  ;;  %s33_s19 = int_to_ptr.vmem [resolvable:$true] %s32_s19  ;;  %s21_s21 = int_to_ptr.vmem [resolvable:$true] %s20_s21 }
   0x5   :  { %s176_s22 = scalar_lea.vmem %s33_s19, 256  ;;  %p181_p1 = scmp.lt.s32.totalorder %s33_s19, %s33_s19 }
   0x6   :  { %p177_p0 = scmp.ne.s32.totalorder %s33_s19, %s176_s22  ;;  %p182_p2 = scmp.lt.s32.totalorder %s176_s22, %s176_s22 }
   0x8   :  { %p183_p3 = por %p182_p2, %p181_p1 }
   0xa   :  { %p184_p4 = pnand %p183_p3, %p177_p0 }
   0xc   :  { %187 = shalt.err (!%p184_p4)
}
   0xd   :  { %s262_s23 = smov 128   ;;  %s263_s24 = smov 8  }
   0xe   :  { %38 = dma.hbm_to_vmem [thread:$0]  %s317_s1, 256, %s33_s19, [#allocation8], %s262_s23, %s262_s23, %s263_s24  }
   0xf   :  { %s196_s27 = scalar_lea.vmem %s21_s21, 256  ;;  %p201_p6 = scmp.lt.s32.totalorder %s21_s21, %s21_s21 }
  0x10   :  { %p197_p5 = scmp.ne.s32.totalorder %s21_s21, %s196_s27  ;;  %p202_p7 = scmp.lt.s32.totalorder %s196_s27, %s196_s27 }
  0x12   :  { %p203_p8 = por %p202_p7, %p201_p6 }
  0x14   :  { %p204_p9 = pnand %p203_p8, %p197_p5 }
  0x16   :  { %207 = shalt.err (!%p204_p9)
}
  0x17   :  { %26 = dma.hbm_to_vmem [thread:$0]  %s316_s0, 256, %s21_s21, [#allocation5], %s262_s23, %s262_s23, %s263_s24  }
  0x18   :  { %s264_s30 = smov [#allocation9]  }
  0x19   :  { %s45_s6 = sshll.u32 %s264_s30, 4  ;;  %s46_s6 = int_to_ptr.vmem [resolvable:$true] %s45_s6 }
  0x1a   :  { %s216_s7 = scalar_lea.vmem %s46_s6, 128  ;;  %p221_p11 = scmp.lt.s32.totalorder %s46_s6, %s46_s6 }
  0x1b   :  { %p217_p10 = scmp.ne.s32.totalorder %s46_s6, %s216_s7  ;;  %p222_p12 = scmp.lt.s32.totalorder %s216_s7, %s216_s7 }
  0x1d   :  { %p223_p13 = por %p222_p12, %p221_p11 }
  0x1f   :  { %p224_p0 = pnand %p223_p13, %p217_p10 }
  0x21   :  { %227 = shalt.err (!%p224_p0)
}
  0x22   :  { %48 = dma.hbm_to_vmem [thread:$0]  %s318_s2, 128, %s46_s6, [#allocation8]  }
  0x23   :  { %252 = dma.done.wait [#allocation5], 256  }
  0x24   :  { %253 = vsyncadd [#allocation5], 4294967040 }
  0x25   :  { %254 = dma.done.wait [#allocation8], 384  }
  0x26   :  { %255 = vsyncadd [#allocation8], 4294966912  ;;  %v64_v0 = vld [vmem:[#allocation4] sm:$0xff]  ;;  %v65_v1 = vld [vmem:[#allocation4 + $0x8] sm:$0xff]  ;;  %s265_s9 = smov [#allocation11]   ;;  %s266_s16 = smov [#allocation10]  }
  0x27   :  { %v66_v2 = vld [vmem:[#allocation7] sm:$0xff]  ;;  %v67_v3 = vld [vmem:[#allocation7 + $0x8] sm:$0xff]  ;;  %v76_v5 = vld [vmem:[#allocation9] sm:$0xff]  ;;  %s267_s19 = smov [#allocation13]  }
  0x28   :  { %v68_v4 = vsub.f32 %v64_v0, %v66_v2  ;;  %v69_v6 = vsub.f32 %v65_v1, %v67_v3  ;;  %166 = vlog2.f32 %v76_v5 }
  0x2a   :  { %v71_v7 = vmul.f32 %v68_v4, %v68_v4  ;;  %v72_v8 = vmul.f32 %v69_v6, %v69_v6 }
  0x2c   :  { %v73_v9 = vadd.f32 %v72_v8, %v71_v7 }
  0x2e   :  { %87 = vadd.xlane.f32.xlu0 %v73_v9 }
  0x35   :  { %v167_v10 = vpop.eup %166 }
  0x36   :  { %v78_v11 = vmul.f32 0.6931472, %v167_v10 }
  0x38   :  { %98 = vadd.xlane.f32.xlu0 %v78_v11 }
  0xb7   :  { %v88_v12 = vpop.xlane.xlu0 %87 }
  0xb8   :  { %v89_v13 = vrot.slane %v88_v12, 4 }
  0xba   :  { %v90_v14 = vadd.f32 %v89_v13, %v88_v12 }
  0xbc   :  { %v91_v15 = vrot.slane %v90_v14, 2 }
  0xbe   :  { %v92_v16 = vadd.f32 %v91_v15, %v90_v14 }
  0xc0   :  { %v93_v17 = vrot.slane %v92_v16, 1 }
  0xc1   :  { %v99_v18 = vpop.xlane.xlu0 %98 }
  0xc2   :  { %v100_v19 = vrot.slane %v99_v18, 4  ;;  %v94_v20 = vadd.f32 %v93_v17, %v92_v16 }
  0xc4   :  { %v101_v21 = vadd.f32 %v100_v19, %v99_v18  ;;  %154 = vpush %v94_v20 }
  0xc6   :  { %v102_v22 = vrot.slane %v101_v21, 2 }
  0xc8   :  { %v103_v23 = vadd.f32 %v102_v22, %v101_v21 }
  0xca   :  { %v104_v24 = vrot.slane %v103_v23, 1 }
  0xcc   :  { %v105_v25 = vadd.f32 %v104_v24, %v103_v23 }
  0xce   :  { %156 = vpush %v105_v25 }
  0xf5   :  { %s155_s0 = spop %154 }
  0xf6   :  { %s96_s2 = smul.f32 0.0006510417, %s155_s0 }
  0xf8   :  { %109 = sst [smem:[#allocation11]] %s96_s2  ;;  %s112_s12 = smul.f32 650.25, %s96_s2 }
  0xf9   :  { %131 = dma.smem_to_hbm %s265_s9, 16, %s320_s4, [#allocation12]  }
  0xff   :  { %s157_s13 = spop %156 }
 0x100   :  { %s107_s14 = smul.f32 -0.0028177637, %s157_s13 }
 0x102   :  { %s113_s15 = sadd.f32 %s112_s12, %s107_s14 }
 0x103   :  { %111 = sst [smem:[#allocation10]] %s107_s14 }
 0x104   :  { %123 = dma.smem_to_hbm %s266_s16, 16, %s319_s3, [#allocation6]  }
 0x105   :  { %115 = sst [smem:[#allocation13]] %s113_s15 }
 0x106   :  { %139 = dma.smem_to_hbm %s267_s19, 16, %s321_s5, [#allocation12]  }
 0x107   :  { %256 = dma.done.wait [#allocation6], 16  }
 0x108   :  { %257 = vsyncadd [#allocation6], 4294967280 }
 0x109   :  { %258 = dma.done.wait [#allocation12], 32  }
 0x10a   :  { %259 = vsyncadd [#allocation12], 4294967264 }
 0x10b   :  { %149 = sfence }
 0x10c   :  { %150 = vsyncpa [#allocation5], 1 }
 0x10d   :  { %151 = vsyncpa [#allocation8], 1 }
 0x10e   :  { %152 = vsyncpa [#allocation6], 1 }
 0x10f   :  { %153 = vsyncpa [#allocation12], 1 }

</bundles_post_ra>
